<compile_context>
chip_gen: v7x
topology: tpu7x:2x2x1
jax: 0.10.0
libtpu: 0.0.40
codegen_flags: <defaults>
</compile_context>

<pallas_src>
import functools

import jax
import jax.numpy as jnp
from jax.experimental import pallas as pl
from jax.experimental.pallas import tpu as pltpu


def _pow_gamma(x, gamma):
    """x**gamma with small integer gammas unrolled to multiplies."""
    g = float(gamma)
    if g == float(int(g)) and 0 <= int(g) <= 4:
        n = int(g)
        if n == 0:
            return jnp.ones_like(x)
        r = x
        for _ in range(n - 1):
            r = r * x
        return r
    return jnp.power(x, jnp.float32(g))


def _focal_loss_kernel(p_ref, l_ref, out_ref, *, alpha, gamma, rows, tile_rows,
                       hard_labels):
    i = pl.program_id(0)

    p = p_ref[...].astype(jnp.float32)
    y = l_ref[...].astype(jnp.float32)

    one = jnp.float32(1.0)
    eps = jnp.float32(1e-7)
    a = jnp.float32(alpha)

    if hard_labels:
        # Exact for 0/1 targets: one log, ~half the elementwise ops.
        pos = y > jnp.float32(0.5)
        pt = jnp.where(pos, p, one - p)
        w = jnp.where(pos, a, one - a)
        loss = -w * _pow_gamma(one - pt, gamma) * jnp.log(pt + eps)
    else:
        # Exact two-term formulation (handles soft labels, matches the module).
        loss = (-a) * _pow_gamma(one - p, gamma) * jnp.log(p + eps) * y \
             + (-(one - a)) * _pow_gamma(p, gamma) * jnp.log(one - p + eps) * (one - y)

    def partial_sum(x):
        # Fold rows (VPU adds + one small sublane reduce); keep lanes separate.
        return jnp.sum(x, axis=0, keepdims=True).reshape(1, 1, -1)

    if rows % tile_rows == 0:
        # Every tile is full -> no masking anywhere.
        out_ref[...] = partial_sum(loss)
    else:
        last = pl.num_programs(0) - 1

        @pl.when(i != last)
        def _():
            out_ref[...] = partial_sum(loss)

        @pl.when(i == last)
        def _():
            # Only the last tile has out-of-bounds rows; value-select (NOT a
            # multiply) so garbage/NaN rows are discarded, never propagated.
            row = jax.lax.broadcasted_iota(jnp.int32, (tile_rows, 1), 0)
            valid = (row + i * tile_rows) < rows
            out_ref[...] = partial_sum(jnp.where(valid, loss, jnp.float32(0.0)))


def _choose_cols(total):
    """Best no-copy 2-D factorization (rows, cols) of the flat size: maximize
    vreg utilization of an (8,128)-tiled (total//cols, cols) view."""
    best_d, best_util = 1, -1.0
    limit = min(total, 2048)
    for d in range(1, limit + 1):
        if total % d:
            continue
        r = total // d
        padded = ((r + 7) // 8) * 8 * ((d + 127) // 128) * 128
        util = total / padded
        if util > best_util + 1e-12 or (abs(util - best_util) <= 1e-12 and d > best_d):
            best_util, best_d = util, d
    return best_d


def focal_loss(preds, labels, alpha=0.25, gamma=2, tile_rows=None,
               hard_labels=False):
    """preds: sigmoid outputs, labels: targets (same arbitrary shape).

    Labels may be any dtype (f32/bf16/int8 0-1 targets are all fine); the
    kernel upcasts to f32 internally, so narrow label dtypes just cut HBM
    traffic.  Set hard_labels=True only if labels are exactly 0/1.
    """
    assert preds.shape == labels.shape
    total = preds.size
    assert total > 0

    cols = _choose_cols(total)
    rows = total // cols

    p2 = preds.reshape(rows, cols)
    l2 = labels.reshape(rows, cols)

    # ~4 MiB f32 per input tile: 2 inputs x 2 pipeline buffers = 16 MiB, well
    # inside the raised 48 MiB scoped-VMEM limit on every generation.
    target_elems = 1 << 20
    if tile_rows is None:
        tile_rows = max(8, (target_elems // max(cols, 1)) // 8 * 8)
    tile_r = int(min(rows, int(tile_rows)))
    if tile_r < rows:
        tile_r = max(8, (tile_r // 8) * 8)   # sublane (8)-aligned when tiled
        tile_r = min(tile_r, rows)

    num_tiles = pl.cdiv(rows, tile_r)

    kernel = functools.partial(
        _focal_loss_kernel,
        alpha=float(alpha),
        gamma=float(gamma),
        rows=rows,
        tile_rows=tile_r,
        hard_labels=bool(hard_labels),
    )

    partials = pl.pallas_call(
        kernel,
        grid=(num_tiles,),
        in_specs=[
            pl.BlockSpec((tile_r, cols), lambda i: (i, 0)),
            pl.BlockSpec((tile_r, cols), lambda i: (i, 0)),
        ],
        out_specs=pl.BlockSpec((1, 1, cols), lambda i: (i, 0, 0)),
        out_shape=jax.ShapeDtypeStruct((num_tiles, 1, cols), jnp.float32),
        compiler_params=pltpu.CompilerParams(
            dimension_semantics=("parallel",),
            vmem_limit_bytes=48 * 1024 * 1024,
        ),
    )(p2, l2)

    # Final (tiny) cross-tile / cross-lane reduction + mean.
    return jnp.sum(partials) / jnp.float32(total)


def _reference(preds, labels, alpha=0.25, gamma=2):
    eps = 1e-7
    p = preds.astype(jnp.float32)
    y = labels.astype(jnp.float32)
    loss_1 = -alpha * jnp.power(1.0 - p, gamma) * jnp.log(p + eps) * y
    loss_0 = -(1.0 - alpha) * jnp.power(p, gamma) * jnp.log(1.0 - p + eps) * (1.0 - y)
    return jnp.mean(loss_0 + loss_1)


if __name__ == "__main__":
    key = jax.random.PRNGKey(0)
    k1, k2, k3, k4, k5, k6 = jax.random.split(key, 6)

    # Case 1: small 4-D sigmoid map (binary segmentation-style), lane-dense view.
    shape1 = (2, 4, 16, 16)
    preds1 = jax.random.uniform(k1, shape1, jnp.float32, 0.01, 0.99)
    labels1 = jax.random.bernoulli(k2, 0.3, shape1).astype(jnp.float32)
    out1 = jax.block_until_ready(focal_loss(preds1, labels1))
    ref1 = _reference(preds1, labels1)
    assert jnp.allclose(out1, ref1, rtol=1e-5, atol=1e-6), (out1, ref1)

    # Case 1b: hard-label fast path (exact for 0/1 targets) + bf16 labels.
    out1h = jax.block_until_ready(
        focal_loss(preds1, labels1.astype(jnp.bfloat16), hard_labels=True))
    assert jnp.allclose(out1h, ref1, rtol=1e-5, atol=1e-6), (out1h, ref1)

    # Case 2: total not divisible by 128 -> densest no-copy 2-D view, masked lanes.
    shape2 = (20, 77)
    preds2 = jax.random.uniform(k3, shape2, jnp.float32, 0.01, 0.99)
    labels2 = jax.random.bernoulli(k4, 0.5, shape2).astype(jnp.float32)
    out2 = jax.block_until_ready(focal_loss(preds2, labels2))
    ref2 = _reference(preds2, labels2)
    assert jnp.allclose(out2, ref2, rtol=1e-5, atol=1e-6), (out2, ref2)

    # Case 3: multi-tile grid with a masked row tail (rows=40, tile_rows=16 -> 3 tiles).
    shape3 = (40, 128)
    preds3 = jax.random.uniform(k5, shape3, jnp.float32, 0.01, 0.99)
    labels3 = jax.random.bernoulli(k6, 0.4, shape3).astype(jnp.float32)
    out3 = jax.block_until_ready(focal_loss(preds3, labels3, tile_rows=16))
    ref3 = _reference(preds3, labels3)
    assert jnp.allclose(out3, ref3, rtol=1e-5, atol=1e-6), (out3, ref3)

    print("KERNEL_OK")
</pallas_src>

<mosaic_0001>
module attributes {stable_mosaic.version = 11 : i64} {
  func.func @_focal_loss_kernel(%arg0: i32, %arg1: memref<8x256xf32, #tpu.memory_space<vmem>>, %arg2: memref<8x256xf32, #tpu.memory_space<vmem>>, %arg3: memref<1x1x256xf32, #tpu.memory_space<vmem>>) attributes {dimension_semantics = [#tpu.dimension_semantics<parallel>], iteration_bounds = array<i64: 1>, scalar_prefetch = 0 : i64, scratch_operands = 0 : i64, tpu.core_type = #tpu.core_type<tc>, window_params = [{transform_indices = @transform_0, window_bounds = array<i64: 8, 256>}, {transform_indices = @transform_1, window_bounds = array<i64: 8, 256>}, {transform_indices = @transform_2, window_bounds = array<i64: 1, 1, 256>}]} {
    %c0 = arith.constant 0 : index
    %c0_0 = arith.constant 0 : index
    %0 = vector.load %arg1[%c0, %c0_0] : memref<8x256xf32, #tpu.memory_space<vmem>>, vector<8x256xf32>
    %c0_1 = arith.constant 0 : index
    %c0_2 = arith.constant 0 : index
    %1 = vector.load %arg2[%c0_1, %c0_2] : memref<8x256xf32, #tpu.memory_space<vmem>>, vector<8x256xf32>
    %cst = arith.constant 0.000000e+00 : f32
    %cst_3 = arith.constant 2.500000e-01 : f32
    %2 = arith.subf %cst, %cst_3 : f32
    %cst_4 = arith.constant 1.000000e+00 : f32
    %3 = vector.broadcast %cst_4 : f32 to vector<8x256xf32>
    %4 = arith.subf %3, %0 : vector<8x256xf32>
    %5 = arith.mulf %4, %4 : vector<8x256xf32>
    %6 = vector.broadcast %2 : f32 to vector<8x256xf32>
    %7 = arith.mulf %6, %5 : vector<8x256xf32>
    %cst_5 = arith.constant 1.000000e-07 : f32
    %8 = vector.broadcast %cst_5 : f32 to vector<8x256xf32>
    %9 = arith.addf %0, %8 : vector<8x256xf32>
    %10 = math.log %9 : vector<8x256xf32>
    %11 = arith.mulf %7, %10 : vector<8x256xf32>
    %12 = arith.mulf %11, %1 : vector<8x256xf32>
    %cst_6 = arith.constant 1.000000e+00 : f32
    %cst_7 = arith.constant 2.500000e-01 : f32
    %13 = arith.subf %cst_6, %cst_7 : f32
    %cst_8 = arith.constant 0.000000e+00 : f32
    %14 = arith.subf %cst_8, %13 : f32
    %15 = arith.mulf %0, %0 : vector<8x256xf32>
    %16 = vector.broadcast %14 : f32 to vector<8x256xf32>
    %17 = arith.mulf %16, %15 : vector<8x256xf32>
    %cst_9 = arith.constant 1.000000e+00 : f32
    %18 = vector.broadcast %cst_9 : f32 to vector<8x256xf32>
    %19 = arith.subf %18, %0 : vector<8x256xf32>
    %cst_10 = arith.constant 1.000000e-07 : f32
    %20 = vector.broadcast %cst_10 : f32 to vector<8x256xf32>
    %21 = arith.addf %19, %20 : vector<8x256xf32>
    %22 = math.log %21 : vector<8x256xf32>
    %23 = arith.mulf %17, %22 : vector<8x256xf32>
    %cst_11 = arith.constant 1.000000e+00 : f32
    %24 = vector.broadcast %cst_11 : f32 to vector<8x256xf32>
    %25 = arith.subf %24, %1 : vector<8x256xf32>
    %26 = arith.mulf %23, %25 : vector<8x256xf32>
    %27 = arith.addf %12, %26 : vector<8x256xf32>
    %cst_12 = arith.constant dense<0.000000e+00> : vector<256xf32>
    %28 = vector.multi_reduction <add>, %27, %cst_12 [0] : vector<8x256xf32> to vector<256xf32>
    %29 = vector.shape_cast %28 : vector<256xf32> to vector<1x256xf32>
    %30 = vector.shape_cast %29 : vector<1x256xf32> to vector<1x1x256xf32>
    %c0_13 = arith.constant 0 : index
    %c0_14 = arith.constant 0 : index
    %c0_15 = arith.constant 0 : index
    %31 = vector.load %arg3[%c0_13, %c0_14, %c0_15] : memref<1x1x256xf32, #tpu.memory_space<vmem>>, vector<1x1x256xf32>
    tpu.vector_store %arg3[%c0_13, %c0_14, %c0_15], %30 {strides = array<i32>} : memref<1x1x256xf32, #tpu.memory_space<vmem>>, vector<1x1x256xf32>,
    return
  }
  func.func @transform_0(%arg0: i32) -> (i32, i32) {
    %c0_i32 = arith.constant 0 : i32
    %c0_i32_0 = arith.constant 0 : i32
    return %arg0, %c0_i32 : i32, i32
  }
  func.func @transform_1(%arg0: i32) -> (i32, i32) {
    %c0_i32 = arith.constant 0 : i32
    %c0_i32_0 = arith.constant 0 : i32
    return %arg0, %c0_i32 : i32, i32
  }
  func.func @transform_2(%arg0: i32) -> (i32, i32, i32) {
    %c0_i32 = arith.constant 0 : i32
    %c0_i32_0 = arith.constant 0 : i32
    %c0_i32_1 = arith.constant 0 : i32
    return %arg0, %c0_i32, %c0_i32_0 : i32, i32, i32
  }
}

</mosaic_0001>

<bundles_post_ra>
// kernel: tpu_custom_call.1
= control target key start
LH: loop header
LB: loop body
LE: loop exit
PB: predicated region body
PF: predicated region fallthrough
CT: control target
= control target key end

     0   :  { %7 = vsyncpa [#allocation3], 0  ;;  %s264_s0 = inlined_call_operand.hbm [shape: f32[8,256], index: 0, kind: input, shape index: {}]   ;;  %s265_s1 = inlined_call_operand.hbm [shape: f32[8,256], index: 1, kind: input, shape index: {}]   ;;  %s266_s2 = inlined_call_operand.hbm [shape: f32[1,1,256], index: 2, kind: output, shape index: {}]  }
   0x1   :  { %8 = vsyncpa [#allocation6], 0 }
   0x2   :  { %9 = vsyncpa [#allocation4], 0  ;;  %s209_s9 = smov [#allocation2]   ;;  %s210_s11 = smov [#allocation5]  }
   0x3   :  { %s16_s10 = sshll.u32 %s209_s9, 4  ;;  %s26_s12 = sshll.u32 %s210_s11, 4  ;;  %s17_s10 = int_to_ptr.vmem [resolvable:$true] %s16_s10  ;;  %s27_s12 = int_to_ptr.vmem [resolvable:$true] %s26_s12 }
   0x4   :  { %s137_s15 = scalar_lea.hbm %s264_s0, 256 }
   0x5   :  { %p138_p0 = scmp.ne.s32.totalorder %s264_s0, %s137_s15  ;;  %p141_p1 = scmp.lt.u32.totalorder %s137_s15, %s264_s0 }
   0x7   :  { %p143_p2 = pnand %p141_p1, %p138_p0 }
   0x9   :  { %146 = shalt.err (!%p143_p2)
}
   0xa   :  { %s147_s20 = scalar_lea.vmem %s17_s10, 256  ;;  %p152_p4 = scmp.lt.s32.totalorder %s17_s10, %s17_s10 }
   0xb   :  { %p148_p3 = scmp.ne.s32.totalorder %s17_s10, %s147_s20  ;;  %p153_p5 = scmp.lt.s32.totalorder %s147_s20, %s147_s20 }
   0xd   :  { %p154_p6 = por %p153_p5, %p152_p4 }
   0xf   :  { %p155_p7 = pnand %p154_p6, %p148_p3 }
  0x11   :  { %158 = shalt.err (!%p155_p7)
}
  0x12   :  { %19 = dma.hbm_to_vmem [thread:$0]  %s264_s0, 256, %s17_s10, [#allocation3]  }
  0x13   :  { %s159_s25 = scalar_lea.hbm %s265_s1, 256 }
  0x14   :  { %p160_p8 = scmp.ne.s32.totalorder %s265_s1, %s159_s25  ;;  %p163_p9 = scmp.lt.u32.totalorder %s159_s25, %s265_s1 }
  0x16   :  { %p165_p10 = pnand %p163_p9, %p160_p8 }
  0x18   :  { %168 = shalt.err (!%p165_p10)
}
  0x19   :  { %s169_s30 = scalar_lea.vmem %s27_s12, 256  ;;  %p174_p12 = scmp.lt.s32.totalorder %s27_s12, %s27_s12 }
  0x1a   :  { %p170_p11 = scmp.ne.s32.totalorder %s27_s12, %s169_s30  ;;  %p175_p13 = scmp.lt.s32.totalorder %s169_s30, %s169_s30 }
  0x1c   :  { %p176_p0 = por %p175_p13, %p174_p12 }
  0x1e   :  { %p177_p1 = pnand %p176_p0, %p170_p11 }
  0x20   :  { %180 = shalt.err (!%p177_p1)
}
  0x21   :  { %29 = dma.hbm_to_vmem [thread:$0]  %s265_s1, 256, %s27_s12, [#allocation6]  }
  0x22   :  { %203 = dma.done.wait [#allocation3], 256  }
  0x23   :  { %204 = vsyncadd [#allocation3], 4294967040 }
  0x24   :  { %205 = dma.done.wait [#allocation6], 256  }
  0x25   :  { %206 = vsyncadd [#allocation6], 4294967040  ;;  %v36_v0 = vld [vmem:[#allocation2] sm:$0xff]  ;;  %v37_v1 = vld [vmem:[#allocation2 + $0x8] sm:$0xff]  ;;  %v211_v42 = vmov 1966171168   ;;  %v92_v44 = vlaneseq }
  0x26   :  { %v40_v2 = vsub.f32 1.0, %v36_v0  ;;  %v41_v3 = vsub.f32 1.0, %v37_v1  ;;  %v46_v4 = vadd.f32 1e-07, %v36_v0  ;;  %v47_v5 = vadd.f32 1e-07, %v37_v1 }
  0x27   :  { %v56_v10 = vmul.f32 %v36_v0, %v36_v0  ;;  %v57_v12 = vmul.f32 %v37_v1, %v37_v1  ;;  %v38_v16 = vld [vmem:[#allocation5] sm:$0xff]  ;;  %v39_v18 = vld [vmem:[#allocation5 + $0x8] sm:$0xff]  ;;  %v90_v43 = vunpack.c.l.s4 %v211_v42  ;;  %v93_v50 = vshrl.u32 %v92_v44, 7  ;;  %s212_s1 = smov [#allocation7]  }
  0x28   :  { %129 = vlog2.f32 %v46_v4  ;;  %v60_v6 = vadd.f32 1e-07, %v40_v2  ;;  %v61_v7 = vadd.f32 1e-07, %v41_v3  ;;  %v42_v8 = vmul.f32 %v40_v2, %v40_v2  ;;  %s115_s4 = sshll.u32 %s212_s1, 4  ;;  %s116_s4 = int_to_ptr.vmem [resolvable:$true] %s115_s4 }
  0x29   :  { %131 = vlog2.f32 %v47_v5  ;;  %v43_v9 = vmul.f32 %v41_v3, %v41_v3  ;;  %v58_v20 = vmul.f32 -0.75, %v56_v10  ;;  %v59_v23 = vmul.f32 -0.75, %v57_v12  ;;  %s181_s5 = scalar_lea.vmem %s116_s4, 32  ;;  %p186_p3 = scmp.lt.s32.totalorder %s116_s4, %s116_s4 }
  0x2a   :  { %133 = vlog2.f32 %v60_v6  ;;  %v44_v11 = vmul.f32 -0.25, %v42_v8  ;;  %v68_v27 = vsub.f32 1.0, %v38_v16  ;;  %v69_v29 = vsub.f32 1.0, %v39_v18  ;;  %p182_p2 = scmp.ne.s32.totalorder %s116_s4, %s181_s5  ;;  %p187_p4 = scmp.lt.s32.totalorder %s181_s5, %s181_s5 }
  0x2b   :  { %135 = vlog2.f32 %v61_v7  ;;  %v45_v14 = vmul.f32 -0.25, %v43_v9  ;;  %v91_v49 = vunpack.c.0.s8 %v90_v43  ;;  %vm106_vm0 = vcmp.lt.s32.totalorder %v92_v44, 256 }
  0x2c   :  { %p188_p5 = por %p187_p4, %p186_p3 }
  0x2d   :  { %v94_v55 = vsub.s32 %v91_v49, %v93_v50 }
  0x2e   :  { %p189_p6 = pnand %p188_p5, %p182_p2 }
  0x32   :  { %v130_v13 = vpop.eup %129 }
  0x33   :  { %v132_v15 = vpop.eup %131  ;;  %v49_v17 = vmul.f32 0.6931472, %v130_v13 }
  0x34   :  { %v51_v19 = vmul.f32 0.6931472, %v132_v15  ;;  %v134_v21 = vpop.eup %133 }
  0x35   :  { %v52_v22 = vmul.f32 %v49_v17, %v44_v11  ;;  %v136_v24 = vpop.eup %135  ;;  %v63_v26 = vmul.f32 0.6931472, %v134_v21 }
  0x36   :  { %v53_v25 = vmul.f32 %v51_v19, %v45_v14  ;;  %v65_v28 = vmul.f32 0.6931472, %v136_v24 }
  0x37   :  { %v54_v30 = vmul.f32 %v52_v22, %v38_v16  ;;  %v66_v31 = vmul.f32 %v63_v26, %v58_v20 }
  0x38   :  { %v55_v32 = vmul.f32 %v53_v25, %v39_v18  ;;  %v67_v33 = vmul.f32 %v65_v28, %v59_v23 }
  0x39   :  { %v70_v34 = vmul.f32 %v68_v27, %v66_v31 }
  0x3a   :  { %v71_v35 = vmul.f32 %v69_v29, %v67_v33 }
  0x3b   :  { %v72_v36 = vadd.f32 %v70_v34, %v54_v30 }
  0x3c   :  { %v73_v37 = vadd.f32 %v71_v35, %v55_v32 }
  0x3d   :  { %v74_v38 = vrot.slane %v72_v36, 4 }
  0x3e   :  { %v80_v39 = vrot.slane %v73_v37, 4 }
  0x3f   :  { %v75_v40 = vadd.f32 %v74_v38, %v72_v36 }
  0x40   :  { %v81_v41 = vadd.f32 %v80_v39, %v73_v37 }
  0x41   :  { %v76_v45 = vrot.slane %v75_v40, 2 }
  0x42   :  { %v82_v46 = vrot.slane %v81_v41, 2 }
  0x43   :  { %v77_v47 = vadd.f32 %v76_v45, %v75_v40 }
  0x44   :  { %v83_v48 = vadd.f32 %v82_v46, %v81_v41 }
  0x45   :  { %v78_v51 = vrot.slane %v77_v47, 1 }
  0x46   :  { %v84_v52 = vrot.slane %v83_v48, 1 }
  0x47   :  { %v79_v53 = vadd.f32 %v78_v51, %v77_v47 }
  0x48   :  { %v85_v54 = vadd.f32 %v84_v52, %v83_v48 }
  0x4a   :  { %v88_v56 = vcombine.low %v79_v53, %v85_v54 }
  0x4c   :  { %v95_v57 = vrot.slane %v88_v56, %v94_v55 }
  0x4e   :  { %v102_v58 = vrot.slane %v95_v57, %v94_v55 }
  0x50   :  { %108 = vst.msk [vmem:[#allocation7] sm:$0x3] %vm106_vm0, %v102_v58 }
  0x51   :  { %192 = shalt.err (!%p189_p6)
}
  0x52   :  { %s193_s8 = scalar_lea.hbm %s266_s2, 32 }
  0x53   :  { %p194_p7 = scmp.ne.s32.totalorder %s266_s2, %s193_s8  ;;  %p197_p8 = scmp.lt.u32.totalorder %s193_s8, %s266_s2 }
  0x55   :  { %p199_p9 = pnand %p197_p8, %p194_p7 }
  0x57   :  { %202 = shalt.err (!%p199_p9)
}
  0x58   :  { %118 = dma.vmem_to_hbm [thread:$0]  %s116_s4, 32, %s266_s2, [#allocation4]  }
  0x59   :  { %207 = dma.done.wait [#allocation4], 32  }
  0x5a   :  { %208 = vsyncadd [#allocation4], 4294967264 }
  0x5b   :  { %122 = vsyncpa [#allocation3], 1 }
  0x5c   :  { %123 = vsyncpa [#allocation6], 1 }
  0x5d   :  { %124 = vsyncpa [#allocation4], 1 }

</bundles_post_ra>
